<compile_context>
chip_gen: v5e
topology: v5e:2x2
jax: 0.10.0
libtpu: 0.0.40
codegen_flags: <defaults>
</compile_context>

<pallas_src>
import math

import jax
import jax.numpy as jnp
from jax.experimental import pallas as pl
from jax.experimental.pallas import tpu as pltpu

EPS = 1e-5


def _layernorm_kernel(x_ref, w_ref, b_ref, o_ref):
    # x_ref: (tile_r, F) -- independent rows on sublanes, normalized axis on lanes.
    # w_ref/b_ref: (1, F) -- broadcast over rows.
    x = x_ref[...].astype(jnp.float32)
    f = x.shape[-1]
    inv_f = jnp.float32(1.0 / f)                            # compile-time constant; no divide
    mean = jnp.sum(x, axis=-1, keepdims=True) * inv_f       # (tile_r, 1)
    xc = x - mean
    var = jnp.sum(xc * xc, axis=-1, keepdims=True) * inv_f  # biased variance (PyTorch LN)
    inv = jax.lax.rsqrt(var + EPS)                          # EUP rsqrt
    y = (xc * inv) * w_ref[...] + b_ref[...]                # all math in f32
    o_ref[...] = y.astype(o_ref.dtype)


def _choose_tile_r(r):
    """Full slab for small / non-multiple-of-8 batches; otherwise tile rows."""
    if r <= 2048 or r % 8 != 0:
        return r
    tile = 2048
    while r % tile != 0:
        tile -= 8
    return max(tile, 8)


def layer_norm(x, weight, bias):
    """x: (..., 2, 2, 3) f32; weight/bias: (2, 2, 3) f32 -> same shape as x."""
    norm_shape = weight.shape
    lead_shape = x.shape[: x.ndim - len(norm_shape)]
    R = math.prod(lead_shape) if lead_shape else 1
    F = math.prod(norm_shape)

    # Free, metadata-only reshapes (row-major contiguous) -- no extra HBM passes.
    x2 = x.reshape(R, F)
    w = weight.reshape(1, F)
    b = bias.reshape(1, F)

    tile_r = _choose_tile_r(R)
    grid_r = R // tile_r

    out = pl.pallas_call(
        _layernorm_kernel,
        out_shape=jax.ShapeDtypeStruct((R, F), x.dtype),
        grid=(grid_r,),
        in_specs=[
            pl.BlockSpec((tile_r, F), lambda i: (i, 0)),
            pl.BlockSpec((1, F), lambda i: (0, 0)),  # weight: revisits (0,0), loaded once
            pl.BlockSpec((1, F), lambda i: (0, 0)),  # bias:   revisits (0,0), loaded once
        ],
        out_specs=pl.BlockSpec((tile_r, F), lambda i: (i, 0)),
        compiler_params=pltpu.CompilerParams(
            dimension_semantics=("parallel",),  # no-op at grid=(1,); shards rows when batched
        ),
    )(x2, w, b)
    return out.reshape(x.shape)


if __name__ == "__main__":
    # Deterministic parameters matching the PyTorch module __init__.
    weight = jnp.array(
        [[[3.0, 2.0, 4.0], [2.0, 3.0, 3.0]],
         [[3.0, 2.0, 4.0], [2.0, 3.0, 3.0]]], dtype=jnp.float32)
    bias = jnp.array(
        [[[0.5, 0.4, 0.3], [0.2, 0.4, 0.3]],
         [[0.5, 0.4, 0.3], [0.2, 0.4, 0.3]]], dtype=jnp.float32)

    key = jax.random.PRNGKey(0)
    x = jax.random.normal(key, (2, 5, 2, 2, 3), dtype=jnp.float32)

    out = layer_norm(x, weight, bias)
    out = jax.block_until_ready(out)

    # Reference check in plain JAX (PyTorch LayerNorm semantics).
    xr = x.reshape(10, 12)
    mean = jnp.mean(xr, axis=-1, keepdims=True)
    var = jnp.mean((xr - mean) ** 2, axis=-1, keepdims=True)
    ref = ((xr - mean) / jnp.sqrt(var + EPS)) * weight.reshape(1, 12) + bias.reshape(1, 12)
    ref = ref.reshape(x.shape)
    assert jnp.allclose(out, ref, atol=1e-5, rtol=1e-5), "mismatch vs reference"

    print("KERNEL_OK")
</pallas_src>

<mosaic_0001>
module attributes {stable_mosaic.version = 11 : i64} {
  func.func @_layernorm_kernel(%arg0: i32, %arg1: memref<10x12xf32, #tpu.memory_space<vmem>>, %arg2: memref<1x12xf32, #tpu.memory_space<vmem>>, %arg3: memref<1x12xf32, #tpu.memory_space<vmem>>, %arg4: memref<10x12xf32, #tpu.memory_space<vmem>>) attributes {dimension_semantics = [#tpu.dimension_semantics<parallel>], iteration_bounds = array<i64: 1>, scalar_prefetch = 0 : i64, scratch_operands = 0 : i64, tpu.core_type = #tpu.core_type<tc>, window_params = [{transform_indices = @transform_0, window_bounds = array<i64: 10, 12>}, {pipeline_mode = #tpu.pipeline_mode<synchronous>, transform_indices = @transform_1, window_bounds = array<i64: 1, 12>}, {pipeline_mode = #tpu.pipeline_mode<synchronous>, transform_indices = @transform_2, window_bounds = array<i64: 1, 12>}, {transform_indices = @transform_3, window_bounds = array<i64: 10, 12>}]} {
    %c0 = arith.constant 0 : index
    %c0_0 = arith.constant 0 : index
    %0 = vector.load %arg1[%c0, %c0_0] : memref<10x12xf32, #tpu.memory_space<vmem>>, vector<10x12xf32>
    %cst = arith.constant dense<0.000000e+00> : vector<10xf32>
    %1 = vector.multi_reduction <add>, %0, %cst [1] : vector<10x12xf32> to vector<10xf32>
    %2 = vector.shape_cast %1 : vector<10xf32> to vector<10x1xf32>
    %cst_1 = arith.constant 0.0833333358 : f32
    %3 = vector.broadcast %cst_1 : f32 to vector<10x1xf32>
    %4 = arith.mulf %2, %3 : vector<10x1xf32>
    %5 = vector.broadcast %4 : vector<10x1xf32> to vector<10x12xf32>
    %6 = arith.subf %0, %5 : vector<10x12xf32>
    %7 = arith.mulf %6, %6 : vector<10x12xf32>
    %cst_2 = arith.constant dense<0.000000e+00> : vector<10xf32>
    %8 = vector.multi_reduction <add>, %7, %cst_2 [1] : vector<10x12xf32> to vector<10xf32>
    %9 = vector.shape_cast %8 : vector<10xf32> to vector<10x1xf32>
    %cst_3 = arith.constant 0.0833333358 : f32
    %10 = vector.broadcast %cst_3 : f32 to vector<10x1xf32>
    %11 = arith.mulf %9, %10 : vector<10x1xf32>
    %cst_4 = arith.constant 9.99999974E-6 : f32
    %12 = vector.broadcast %cst_4 : f32 to vector<10x1xf32>
    %13 = arith.addf %11, %12 : vector<10x1xf32>
    %14 = math.rsqrt %13 : vector<10x1xf32>
    %15 = vector.broadcast %14 : vector<10x1xf32> to vector<10x12xf32>
    %16 = arith.mulf %6, %15 : vector<10x12xf32>
    %c0_5 = arith.constant 0 : index
    %c0_6 = arith.constant 0 : index
    %17 = vector.load %arg2[%c0_5, %c0_6] : memref<1x12xf32, #tpu.memory_space<vmem>>, vector<1x12xf32>
    %18 = vector.broadcast %17 : vector<1x12xf32> to vector<10x12xf32>
    %19 = arith.mulf %16, %18 : vector<10x12xf32>
    %c0_7 = arith.constant 0 : index
    %c0_8 = arith.constant 0 : index
    %20 = vector.load %arg3[%c0_7, %c0_8] : memref<1x12xf32, #tpu.memory_space<vmem>>, vector<1x12xf32>
    %21 = vector.broadcast %20 : vector<1x12xf32> to vector<10x12xf32>
    %22 = arith.addf %19, %21 : vector<10x12xf32>
    %c0_9 = arith.constant 0 : index
    %c0_10 = arith.constant 0 : index
    %23 = vector.load %arg4[%c0_9, %c0_10] : memref<10x12xf32, #tpu.memory_space<vmem>>, vector<10x12xf32>
    tpu.vector_store %arg4[%c0_9, %c0_10], %22 {strides = array<i32>} : memref<10x12xf32, #tpu.memory_space<vmem>>, vector<10x12xf32>,
    return
  }
  func.func @transform_0(%arg0: i32) -> (i32, i32) {
    %c0_i32 = arith.constant 0 : i32
    %c0_i32_0 = arith.constant 0 : i32
    return %arg0, %c0_i32 : i32, i32
  }
  func.func @transform_1(%arg0: i32) -> (i32, i32) {
    %c0_i32 = arith.constant 0 : i32
    %c0_i32_0 = arith.constant 0 : i32
    %c0_i32_1 = arith.constant 0 : i32
    return %c0_i32, %c0_i32_0 : i32, i32
  }
  func.func @transform_2(%arg0: i32) -> (i32, i32) {
    %c0_i32 = arith.constant 0 : i32
    %c0_i32_0 = arith.constant 0 : i32
    %c0_i32_1 = arith.constant 0 : i32
    return %c0_i32, %c0_i32_0 : i32, i32
  }
  func.func @transform_3(%arg0: i32) -> (i32, i32) {
    %c0_i32 = arith.constant 0 : i32
    %c0_i32_0 = arith.constant 0 : i32
    return %arg0, %c0_i32 : i32, i32
  }
}

</mosaic_0001>

<bundles_post_ra>
// kernel: tpu_custom_call.1
= control target key start
LH: loop header
LB: loop body
LE: loop exit
PB: predicated region body
PF: predicated region fallthrough
CT: control target
= control target key end

     0   :  { %8 = vsyncpa [#allocation3], 0  ;;  %s265_s0 = inlined_call_operand.hbm [shape: f32[10,12], index: 0, kind: input, shape index: {}]   ;;  %s266_s1 = inlined_call_operand.hbm [shape: f32[1,12], index: 1, kind: input, shape index: {}]   ;;  %s267_s2 = inlined_call_operand.vmem [shape: f32[1,12], index: 2, kind: input, shape index: {}]   ;;  %s268_s3 = inlined_call_operand.hbm [shape: f32[10,12], index: 3, kind: output, shape index: {}]  }
   0x1   :  { %9 = vsyncpa [#allocation6], 0 }
   0x2   :  { %10 = vsyncpa [#allocation4], 0  ;;  %s15_s14 = sshll.u32 %s265_s0, 4  ;;  %s216_s15 = smov [#allocation2]   ;;  %s16_s14 = int_to_ptr.hbm [resolvable:$true] %s15_s14 }
   0x3   :  { %s17_s16 = sshll.u32 %s216_s15, 4  ;;  %s29_s19 = sshll.u32 %s266_s1, 4  ;;  %s18_s16 = int_to_ptr.vmem [resolvable:$true] %s17_s16  ;;  %s30_s19 = int_to_ptr.hbm [resolvable:$true] %s29_s19 }
   0x4   :  { %s217_s20 = smov 128   ;;  %s218_s21 = smov 8  }
   0x5   :  { %23 = dma.hbm_to_vmem [thread:$0]  %s16_s14, 256, %s18_s16, [#allocation3], %s217_s20, %s217_s20, %s218_s21  }
   0x6   :  { %s219_s22 = smov [#allocation5]  }
   0x7   :  { %s31_s23 = sshll.u32 %s219_s22, 4  ;;  %s32_s23 = int_to_ptr.vmem [resolvable:$true] %s31_s23 }
   0x8   :  { %34 = dma.hbm_to_vmem [thread:$0]  %s30_s19, 16, %s32_s23, [#allocation6]  }
   0x9   :  { %210 = dma.done.wait [#allocation3], 256  }
   0xa   :  { %211 = vsyncadd [#allocation3], 4294967040 }
   0xb   :  { %212 = dma.done.wait [#allocation6], 16  }
   0xc   :  { %213 = vsyncadd [#allocation6], 4294967280  ;;  %vm47_vm0 = vcmask 97280   ;;  %v45_v0 = vld [vmem:[#allocation2] sm:$0xff]  ;;  %v46_v2 = vld [vmem:[#allocation2 + $0x8] sm:$0x3] }
   0xd   :  { %v48_v1 = vsel %vm47_vm0, %v45_v0, 0.0  ;;  %vm51_vm1 = vcmask 91136   ;;  %v132_v28 = vld [vmem:[#allocation5] ss:$0 sm:$0xff]  ;;  %v133_v32 = vld [vmem:[%s267_s2] ss:$0 sm:$0xff] }
   0xe   :  { %49 = vadd.xlane.f32.xlu0 %v48_v1  ;;  %v52_v3 = vsel %vm51_vm1, %v46_v2, 0.0  ;;  %s220_s24 = smov [#allocation7]   ;;  %s113_s28 = sshll.u32 %s268_s3, 4  ;;  %s114_s28 = int_to_ptr.hbm [resolvable:$true] %s113_s28 }
   0xf   :  { %s111_s25 = sshll.u32 %s220_s24, 4  ;;  %s112_s25 = int_to_ptr.vmem [resolvable:$true] %s111_s25 }
  0x16   :  { %53 = vadd.xlane.f32.xlu0 %v52_v3 }
  0x81   :  { %v50_v4 = vpop.xlane.xlu0 %49 }
  0x82   :  { %v55_v5 = vmul.f32 0.083333336, %v50_v4 }
  0x84   :  { %v57_v6 = vsub.f32 %v45_v0, %v55_v5 }
  0x86   :  { %v59_v7 = vmul.f32 %v57_v6, %v57_v6 }
  0x88   :  { %v61_v8 = vsel %vm47_vm0, %v59_v7, 0.0 }
  0x89   :  { %62 = vadd.xlane.f32.xlu1 %v61_v8  ;;  %v54_v9 = vpop.xlane.xlu0 %53 }
  0x8a   :  { %v56_v10 = vmul.f32 0.083333336, %v54_v9 }
  0x8c   :  { %v58_v11 = vsub.f32 %v46_v2, %v56_v10 }
  0x8e   :  { %v60_v12 = vmul.f32 %v58_v11, %v58_v11 }
  0x90   :  { %v64_v13 = vsel %vm51_vm1, %v60_v12, 0.0 }
  0x91   :  { %65 = vadd.xlane.f32.xlu1 %v64_v13 }
  0xfc   :  { %v63_v14 = vpop.xlane.xlu1 %62 }
  0xfd   :  { %v67_v15 = vmul.f32 0.083333336, %v63_v14 }
  0xff   :  { %v69_v16 = vadd.f32 1e-05, %v67_v15 }
 0x101   :  { %134 = vrsqrt.f32 %v69_v16  ;;  %vm77_vm3 = vweird.f32 %v69_v16 }
 0x104   :  { %v66_v17 = vpop.xlane.xlu1 %65 }
 0x105   :  { %v68_v18 = vmul.f32 0.083333336, %v66_v17 }
 0x107   :  { %v135_v19 = vpop.eup %134  ;;  %v70_v20 = vadd.f32 1e-05, %v68_v18 }
 0x108   :  { %v72_v21 = vmul.f32 %v135_v19, %v69_v16  ;;  %vm78_vm2 = vweird.f32 %v135_v19 }
 0x109   :  { %136 = vrsqrt.f32 %v70_v20  ;;  %vm79_vm4 = vmor %vm77_vm3, %vm78_vm2  ;;  %vm87_vm6 = vweird.f32 %v70_v20 }
 0x10a   :  { %v73_v22 = vmul.f32 %v135_v19, %v72_v21 }
 0x10c   :  { %v74_v23 = vmul.f32 0.5, %v73_v22 }
 0x10e   :  { %v75_v24 = vsub.f32 1.5, %v74_v23 }
 0x10f   :  { %v137_v25 = vpop.eup %136 }
 0x110   :  { %v76_v26 = vmul.f32 %v135_v19, %v75_v24  ;;  %v82_v27 = vmul.f32 %v137_v25, %v70_v20  ;;  %vm88_vm5 = vweird.f32 %v137_v25 }
 0x111   :  { %vm89_vm7 = vmor %vm87_vm6, %vm88_vm5 }
 0x112   :  { %v80_v29 = vsel %vm79_vm4, %v135_v19, %v76_v26  ;;  %v83_v30 = vmul.f32 %v137_v25, %v82_v27 }
 0x113   :  { %v91_v31 = vmul.f32 %v80_v29, %v57_v6 }
 0x114   :  { %v84_v33 = vmul.f32 0.5, %v83_v30 }
 0x115   :  { %v97_v34 = vmul.f32 %v132_v28, %v91_v31 }
 0x116   :  { %v85_v35 = vsub.f32 1.5, %v84_v33 }
 0x117   :  { %v103_v36 = vadd.f32 %v133_v32, %v97_v34 }
 0x118   :  { %v86_v37 = vmul.f32 %v137_v25, %v85_v35 }
 0x119   :  { %105 = vst.msk [vmem:[#allocation7] sm:$0xff] %vm47_vm0, %v103_v36 }
 0x11a   :  { %v90_v38 = vsel %vm89_vm7, %v137_v25, %v86_v37 }
 0x11b   :  { %v92_v39 = vmul.f32 %v90_v38, %v58_v11 }
 0x11d   :  { %v98_v40 = vmul.f32 %v132_v28, %v92_v39 }
 0x11f   :  { %v104_v41 = vadd.f32 %v133_v32, %v98_v40 }
 0x121   :  { %106 = vst.msk [vmem:[#allocation7 + $0x8] sm:$0x3] %vm51_vm1, %v104_v41 }
 0x122   :  { %119 = dma.vmem_to_hbm [thread:$0]  %s112_s25, 256, %s114_s28, [#allocation4], %s217_s20, %s217_s20, %s218_s21  }
 0x123   :  { %214 = dma.done.wait [#allocation4], 256  }
 0x124   :  { %215 = vsyncadd [#allocation4], 4294967040 }
 0x125   :  { %124 = vsyncpa [#allocation3], 1 }
 0x126   :  { %125 = vsyncpa [#allocation6], 1 }
 0x127   :  { %126 = vsyncpa [#allocation4], 1 }

</bundles_post_ra>
